<compile_context>
chip_gen: v7x
topology: tpu7x:2x2x1
jax: 0.10.0
libtpu: 0.0.40
codegen_flags: <defaults>
</compile_context>

<pallas_src>
import functools

import numpy as np
import jax
import jax.numpy as jnp
from jax.experimental import pallas as pl
from jax.experimental.pallas import tpu as pltpu


# ---------------------------------------------------------------------------
# Pallas kernel: one fused bf16 MXU matmul with f32 accumulation.
#   rows    (M) = K * Cout          (all transposed-conv taps fused)
#   columns (N) = B * L (lanes)     (batch folded into lanes -> lane-dense store)
#   contraction = Cin + 1           (input channels + coordinate channel)
# ---------------------------------------------------------------------------
def _fused_tap_matmul_kernel(x_ref, w_ref, y_ref):
    # x_ref: (Cin+1, NT) bf16 ; w_ref: (K*Cout, Cin+1) bf16 ; y_ref: (K*Cout, NT) f32
    y_ref[...] = jnp.dot(w_ref[...], x_ref[...], preferred_element_type=jnp.float32)


def _pick_lane_tile(n):
    """Lane tile over the fused B*L dim.

    Must be a multiple of 128 or the full dim (Pallas (8,128) block constraint).
    Prefer >=2 blocks so the 'parallel' grid axis can use both v7x TensorCores,
    and cap the tile so double-buffered blocks stay well under v7x's 64 MiB VMEM.
    """
    if n % 256 != 0:
        return n                      # single full-extent block (small / unaligned N)
    nt = n // 2                       # multiple of 128 and divides n
    while nt > 2048 and nt % 256 == 0:
        nt //= 2
    return nt


@functools.partial(jax.jit, static_argnames=("stride", "padding", "output_padding",
                                             "dilation"))
def coord_conv_transpose_1d(x, weight, bias, *, stride=1, padding=0,
                            output_padding=0, dilation=1):
    """CoordConvTranspose1d forward.

    x:      (B, Cin, L)        NCL, like torch Conv1d inputs
    weight: (Cin+1, Cout, K)   torch nn.ConvTranspose1d.weight layout
    bias:   (Cout,)
    returns (B, Cout, L_out)   float32
    """
    B, Cin, L = x.shape
    Cin_aug, Cout, K = weight.shape
    assert Cin_aug == Cin + 1, "weight must have in_channels + 1 input channels"
    L_out = (L - 1) * stride - 2 * padding + dilation * (K - 1) + output_padding + 1

    # ---- AddCoords(rank=1), hoisted out of the kernel (free in XLA) ----
    denom = jnp.float32(max(L - 1, 1))            # guard the L == 1 edge case
    coord = (jnp.arange(L, dtype=jnp.float32) / denom) * 2.0 - 1.0
    x_aug = jnp.concatenate(
        [x.astype(jnp.float32), jnp.broadcast_to(coord, (B, 1, L))], axis=1)

    # ---- operand packing: bf16 operands (f32 accumulation in the MXU),
    #      batch folded into the lane/N dim, all K taps fused into the M dim ----
    x_mat = jnp.transpose(x_aug, (1, 0, 2)).reshape(Cin_aug, B * L).astype(jnp.bfloat16)
    w_t = jnp.transpose(weight, (2, 1, 0)).reshape(K * Cout, Cin_aug).astype(jnp.bfloat16)

    N = B * L
    NT = _pick_lane_tile(N)
    grid = (N // NT,)
    m_rows = K * Cout

    # TODO(synk): for very large L, an extra "arbitrary" L-tiling axis with halo
    # accumulation would bound VMEM further; unnecessary at these sizes.
    y = pl.pallas_call(
        _fused_tap_matmul_kernel,
        grid=grid,
        in_specs=[
            pl.BlockSpec((Cin_aug, NT), lambda n: (0, n)),
            pl.BlockSpec((m_rows, Cin_aug), lambda n: (0, 0)),
        ],
        out_specs=pl.BlockSpec((m_rows, NT), lambda n: (0, n)),
        out_shape=jax.ShapeDtypeStruct((m_rows, N), jnp.float32),
        compiler_params=pltpu.CompilerParams(dimension_semantics=("parallel",)),
        cost_estimate=pl.CostEstimate(
            flops=2 * N * Cin_aug * m_rows,
            transcendentals=0,
            bytes_accessed=Cin_aug * N * 2 + m_rows * Cin_aug * 2 + m_rows * N * 4),
    )(x_mat, w_t)

    # ---- XLA epilogue: per-tap overlap-add (grouped by stride residue), crop, bias.
    #      O(K*B*Cout*L) adds -- negligible next to the matmul. ----
    yk = y.reshape(K, Cout, B, L)                  # rows k*Cout + c, cols b*L + l
    n_s = L + (dilation * (K - 1)) // stride + 1   # slots per stride residue
    acc = jnp.zeros((stride, B, Cout, n_s), jnp.float32)
    for k in range(K):                             # K is small & static
        p0 = k * dilation
        r, s_off = p0 % stride, p0 // stride
        contrib = jnp.transpose(yk[k], (1, 0, 2))  # (B, Cout, L)
        contrib = jnp.pad(contrib, ((0, 0), (0, 0), (s_off, n_s - s_off - L)))
        acc = acc.at[r].add(contrib)
    # ungroup: full position p = slot*stride + r  <->  acc[r, :, :, slot]
    full = jnp.transpose(acc, (1, 2, 3, 0)).reshape(B, Cout, n_s * stride)
    out = full[:, :, padding:padding + L_out]
    return out + bias.astype(jnp.float32)[None, :, None]


def _reference_numpy(x, weight, bias, stride, padding, output_padding, dilation):
    x = np.asarray(x, np.float64)
    w = np.asarray(weight, np.float64)
    b = np.asarray(bias, np.float64)
    B, Cin, L = x.shape
    _, Cout, K = w.shape
    coord = (np.arange(L, dtype=np.float64) / max(L - 1, 1)) * 2.0 - 1.0
    x_aug = np.concatenate([x, np.broadcast_to(coord, (B, 1, L))], axis=1)
    L_out = (L - 1) * stride - 2 * padding + dilation * (K - 1) + output_padding + 1
    L_full = (L - 1) * stride + dilation * (K - 1) + 1
    full = np.zeros((B, Cout, L_full))
    for s in range(L):
        for k in range(K):
            full[:, :, s * stride + k * dilation] += np.einsum(
                'bi,io->bo', x_aug[:, :, s], w[:, :, k])
    out = np.zeros((B, Cout, L_out))
    valid = min(L_out, L_full - padding)
    out[:, :, :valid] = full[:, :, padding:padding + valid]
    out += b[None, :, None]
    return out


if __name__ == "__main__":
    key = jax.random.PRNGKey(0)
    kx, kw, kb = jax.random.split(key, 3)

    # small shapes consistent with the module
    B, Cin, L = 2, 4, 16
    Cout, K = 8, 3
    stride, padding, output_padding, dilation = 2, 1, 1, 1

    x = jax.random.normal(kx, (B, Cin, L), jnp.float32)
    bound = 1.0 / np.sqrt((Cin + 1) * K)
    weight = jax.random.uniform(kw, (Cin + 1, Cout, K), jnp.float32, -bound, bound)
    bias = jax.random.uniform(kb, (Cout,), jnp.float32, -bound, bound)

    out = coord_conv_transpose_1d(x, weight, bias, stride=stride, padding=padding,
                                  output_padding=output_padding, dilation=dilation)
    out = jax.block_until_ready(out)

    ref = _reference_numpy(x, weight, bias, stride, padding, output_padding, dilation)
    assert out.shape == ref.shape, (out.shape, ref.shape)
    # bf16 operands with f32 accumulation -> loosened tolerance vs the f64 reference
    np.testing.assert_allclose(np.asarray(out), ref, rtol=2e-2, atol=5e-2)
    print("KERNEL_OK")
</pallas_src>

<mosaic_0001>
module attributes {stable_mosaic.version = 11 : i64} {
  func.func @_fused_tap_matmul_kernel(%arg0: i32, %arg1: memref<5x32xbf16, #tpu.memory_space<vmem>>, %arg2: memref<24x5xbf16, #tpu.memory_space<vmem>>, %arg3: memref<24x32xf32, #tpu.memory_space<vmem>>) attributes {dimension_semantics = [#tpu.dimension_semantics<parallel>], iteration_bounds = array<i64: 1>, scalar_prefetch = 0 : i64, scratch_operands = 0 : i64, tpu.core_type = #tpu.core_type<tc>, window_params = [{transform_indices = @transform_0, window_bounds = array<i64: 5, 32>}, {pipeline_mode = #tpu.pipeline_mode<synchronous>, transform_indices = @transform_1, window_bounds = array<i64: 24, 5>}, {transform_indices = @transform_2, window_bounds = array<i64: 24, 32>}]} {
    %c0 = arith.constant 0 : index
    %c0_0 = arith.constant 0 : index
    %0 = vector.load %arg2[%c0, %c0_0] : memref<24x5xbf16, #tpu.memory_space<vmem>>, vector<24x5xbf16>
    %c0_1 = arith.constant 0 : index
    %c0_2 = arith.constant 0 : index
    %1 = vector.load %arg1[%c0_1, %c0_2] : memref<5x32xbf16, #tpu.memory_space<vmem>>, vector<5x32xbf16>
    %cst = arith.constant dense<0.000000e+00> : vector<24x32xf32>
    %2 = tpu.matmul %0, %1, %cst {dimension_numbers = #tpu.dot_dimension_numbers<[1], [0], [0], [1], [0, 0, 1, 1], [], []>} : vector<24x5xbf16>, vector<5x32xbf16>, vector<24x32xf32> -> vector<24x32xf32>
    %c0_3 = arith.constant 0 : index
    %c0_4 = arith.constant 0 : index
    %3 = vector.load %arg3[%c0_3, %c0_4] : memref<24x32xf32, #tpu.memory_space<vmem>>, vector<24x32xf32>
    tpu.vector_store %arg3[%c0_3, %c0_4], %2 {strides = array<i32>} : memref<24x32xf32, #tpu.memory_space<vmem>>, vector<24x32xf32>,
    return
  }
  func.func @transform_0(%arg0: i32) -> (i32, i32) {
    %c0_i32 = arith.constant 0 : i32
    %c0_i32_0 = arith.constant 0 : i32
    return %c0_i32, %arg0 : i32, i32
  }
  func.func @transform_1(%arg0: i32) -> (i32, i32) {
    %c0_i32 = arith.constant 0 : i32
    %c0_i32_0 = arith.constant 0 : i32
    %c0_i32_1 = arith.constant 0 : i32
    return %c0_i32, %c0_i32_0 : i32, i32
  }
  func.func @transform_2(%arg0: i32) -> (i32, i32) {
    %c0_i32 = arith.constant 0 : i32
    %c0_i32_0 = arith.constant 0 : i32
    return %c0_i32, %arg0 : i32, i32
  }
}

</mosaic_0001>

<bundles_post_ra>
// kernel: squeeze.3
= control target key start
LH: loop header
LB: loop body
LE: loop exit
PB: predicated region body
PF: predicated region fallthrough
CT: control target
= control target key end

     0   :  { %vm3_vm0 = vcmask 130048   ;;  %s113_s0 = inlined_call_operand.vmem [shape: f32[8,32], index: 0, kind: input, shape index: {}]   ;;  %s114_s1 = inlined_call_operand.vmem [shape: f32[8,2,16], index: 1, kind: output, shape index: {}]  }
   0x1   :  { %v6_v0 = vld [vmem:[%s113_s0] sm:$0xff]   ;;  %s75_s0 = smov 112  }
   0x2   :  { %7 = vrot.lane.b32.xlu0 %v6_v0, %s75_s0  ;;  %4 = vst.msk [vmem:[#allocation0] ss:$8 sm:$0xf] %vm3_vm0, %v6_v0   ;;  %5 = vst.msk [vmem:[#allocation0] ss:$8 sm:$0xf0] %vm3_vm0, %v6_v0  }
  0x74   :  { %v8_v1 = vpop.permute.xlu0 %7  }
  0x75   :  { %11 = vst.msk [vmem:[#allocation0 + $0x1] ss:$8 sm:$0xf] %vm3_vm0, %v8_v1   ;;  %13 = vst.msk [vmem:[#allocation0 + $0x1] ss:$8 sm:$0xf0] %vm3_vm0, %v8_v1  }
  0x7c   :  { %v17_v2 = vld [vmem:[#allocation0] sm:$0x3]  ;;  %v21_v3 = vld [vmem:[#allocation0 + $0x8] sm:$0x3]  ;;  %v26_v4 = vld [vmem:[#allocation0 + $0x10] sm:$0x3] }
  0x7d   :  { %19 = vst [vmem:[%s114_s1] sm:$0x3] %v17_v2  ;;  %67 = vst [vmem:[%s114_s1 + $0x2] sm:$0x3] %v21_v3  ;;  %v32_v5 = vld [vmem:[#allocation0 + $0x18] sm:$0x3] }
  0x7e   :  { %68 = vst [vmem:[%s114_s1 + $0x4] sm:$0x3] %v26_v4  ;;  %v38_v6 = vld [vmem:[#allocation0 + $0x20] sm:$0x3]  ;;  %v44_v7 = vld [vmem:[#allocation0 + $0x28] sm:$0x3] }
  0x7f   :  { %69 = vst [vmem:[%s114_s1 + $0x6] sm:$0x3] %v32_v5  ;;  %70 = vst [vmem:[%s114_s1 + $0x8] sm:$0x3] %v38_v6  ;;  %v50_v8 = vld [vmem:[#allocation0 + $0x30] sm:$0x3] }
  0x80   :  { %71 = vst [vmem:[%s114_s1 + $0xa] sm:$0x3] %v44_v7  ;;  %v56_v9 = vld [vmem:[#allocation0 + $0x38] sm:$0x3]  ;;  %72 = vst [vmem:[%s114_s1 + $0xc] sm:$0x3] %v50_v8 }
  0x81   :  { %73 = vst [vmem:[%s114_s1 + $0xe] sm:$0x3] %v56_v9 }

// kernel: coord_conv_transpose_1d.1
= control target key start
LH: loop header
LB: loop body
LE: loop exit
PB: predicated region body
PF: predicated region fallthrough
CT: control target
= control target key end

     0   :  { %vm31_vm0 = vcmask 1041408   ;;  %vm32_vm1 = vcmask 1042432   ;;  %vm24_vm2 = vcmask 39936   ;;  %v110_v1 = vmov 65535   ;;  %s144_s0 = inlined_call_operand.vmem [shape: bf16[5,32], index: 0, kind: input, shape index: {}]   ;;  %s145_s1 = inlined_call_operand.vmem [shape: bf16[24,5], index: 1, kind: input, shape index: {}]   ;;  %s146_s2 = inlined_call_operand.vmem [shape: f32[24,32], index: 2, kind: output, shape index: {}]  }
   0x1   :  { %v15_v0 = vld [vmem:[%s144_s0] sm:$0x7]  ;;  %v33_v2 = vsel %vm31_vm0, 4294967295, %v110_v1  ;;  %v109_v6 = vld [vmem:[%s145_s1 + $0x8] ss:$0 sps:$4 sm:$0xff]   ;;  %vm86_vm3 = vcmask 261120  }
   0x2   :  { %v108_v3 = vld [vmem:[%s145_s1] sm:$0xff]   ;;  %v34_v4 = vsel %vm32_vm1, %v33_v2, 0 }
   0x3   :  { %v36_v5 = vand.u32 %v34_v4, %v15_v0  ;;  %103 = vmatprep.mubr.msk.bf16.mxu0 %vm24_vm2, %v108_v3 }
   0x5   :  { %101 = vmatprep.subr.bf16.mxu0 %v36_v5 }
   0x6   :  { %102 = vmatpush3.bf16.msra.mxu0 %v36_v5 }
   0x9   :  { %104 = vmatmul.mubr.msk.bf16.vlgmr.msra.gmra.mrb[0].mxu0 %vm24_vm2, %v109_v6 }
  0xdc   :  { %v105_v7 = vpop.f32.mrb[0].mxu0 }
  0xdd   :  { %89 = vst.msk [vmem:[%s146_s2 + $0x10] sm:$0xff] %vm86_vm3, %v105_v7  ;;  %v72_v8 = vpop.f32.mrb[1].mxu0 }
  0xde   :  { %87 = vst.msk [vmem:[%s146_s2] sm:$0xff] %vm86_vm3, %v72_v8  ;;  %v106_v9 = vpop.f32.mrb[2].mxu0 }
  0xdf   :  { %v75_v10 = vpop.f32.mrb[3].mxu0 }
  0xe0   :  { %88 = vst.msk [vmem:[%s146_s2 + $0x8] sm:$0xff] %vm86_vm3, %v75_v10 }

</bundles_post_ra>
